<compile_context>
chip_gen: v7x
topology: tpu7x:2x2x1
jax: 0.10.0
libtpu: 0.0.40
codegen_flags: <defaults>
</compile_context>

<pallas_src>
import functools

import jax
import jax.numpy as jnp
from jax import lax
from jax.experimental import pallas as pl
from jax.experimental.pallas import tpu as pltpu

# ---------------- model sizes (small, consistent with the module) -----------
TARGET_SIZE = 64   # vocab V
EMBED_SIZE = 32    # E
HIDDEN_SIZE = 32   # H
BATCH = 8


# ---------------------------- Pallas kernel ---------------------------------
def word_decoder_seq_kernel(V, ids_ref, h0_ref, c0_ref, g_ref, whh_ref, hc_out_ref):
    """T-step (embedding- and bias-folded) LSTMCell decode, one batch block.

    ids_ref : (T, Bblk, 1) int32  token ids per step
    h0_ref  : (Bblk, H)    f32    initial hidden state
    c0_ref  : (Bblk, H)    f32    initial cell state
    g_ref   : (V, 4H)      f32    embed @ W_ih.T + (b_ih + b_hh)   (bias folded)
    whh_ref : (H, 4H)      f32    W_hh.T
    hc_out  : (Bblk, 2H)   f32    packed [h_T | c_T]  (written once)
    """
    T = ids_ref.shape[0]
    B, H = h0_ref.shape

    # Loaded once per pallas_call; ~12 vregs total, stays resident across the loop.
    g_w = g_ref[...]                                             # (V, 4H)
    whh = whh_ref[...]                                           # (H, 4H)
    lane = jax.lax.broadcasted_iota(jnp.int32, (B, V), 1)        # hoisted (no per-step broadcast)

    def step(t, carry):
        h, c = carry
        ids = ids_ref[t]                                         # (B, 1) int32
        # One-hot selector built in-register; padding_idx=0 handled by the
        # zeroed embed row 0 inside the folded table g_w.
        onehot = (lane == ids).astype(jnp.float32)               # (B, V)

        # Two MXU pushes, no lane assembly, bias already folded into g_w rows.
        gates = (jnp.dot(onehot, g_w, preferred_element_type=jnp.float32)
                 + jnp.dot(h, whh, preferred_element_type=jnp.float32))    # (B, 4H)

        # Full-vreg activations (one sigmoid + one tanh over the whole (8,128)
        # register), then 32-lane extracts (PyTorch i, f, g, o gate order).
        sig = jax.nn.sigmoid(gates)
        tah = jnp.tanh(gates)
        i_g = sig[:, 0 * H:1 * H]
        f_g = sig[:, 1 * H:2 * H]
        g_g = tah[:, 2 * H:3 * H]
        o_g = sig[:, 3 * H:4 * H]

        c_new = f_g * c + i_g * g_g
        h_new = o_g * jnp.tanh(c_new)
        return h_new, c_new

    h_fin, c_fin = lax.fori_loop(0, T, step, (h0_ref[...], c0_ref[...]),
                                 unroll=T <= 8)
    hc_out_ref[...] = jnp.concatenate([h_fin, c_fin], axis=-1)   # single (B, 2H) store


# --------------------------- one-time weight prep ----------------------------
def prepare_decoder_params(params):
    """Fold embedding, input projection and both biases into one (V, 4H) table.

    Done ONCE per checkpoint (outside any decode loop).  Row 0 of the embedding
    is explicitly zeroed so padding_idx=0 semantics are preserved even if the
    checkpoint's row 0 is nonzero.
    """
    V, E = params["embed"].shape
    H = params["w_hh"].shape[1]

    bias = params["b_ih"] + params["b_hh"]                       # (4H,)
    embed_eff = params["embed"].at[0].set(0.0)                   # enforce padding_idx=0
    g_comb = embed_eff @ params["w_ih"].T + bias[None, :]        # (V, 4H)
    whh_t = params["w_hh"].T                                     # (H, 4H)

    return dict(g_comb=jnp.asarray(g_comb, jnp.float32),
                whh_t=jnp.asarray(whh_t, jnp.float32),
                V=int(V), H=int(H))


# ------------------------------ forward wrappers -----------------------------
def word_decoder_decode(ids_tb, w_hx, w_cx, prep, *, batch_block=None):
    """Run T LSTMCell steps in ONE pallas_call.

    ids_tb : (T, B) int32 token ids (teacher-forced); w_hx/w_cx: (B, H) f32.
    Returns the final (h, c) after T steps.
    """
    T, B = ids_tb.shape
    V, H = prep["V"], prep["H"]
    if batch_block is None:
        batch_block = B                       # one block; on v7x pass B//2 per TC
    assert B % batch_block == 0

    ids = ids_tb.reshape(T, B, 1).astype(jnp.int32)

    hc = pl.pallas_call(
        functools.partial(word_decoder_seq_kernel, V),
        out_shape=jax.ShapeDtypeStruct((B, 2 * H), jnp.float32),
        grid_spec=pltpu.PrefetchScalarGridSpec(
            num_scalar_prefetch=0,
            grid=(B // batch_block,),         # "parallel" stream blocks (v7x dual-TC)
            in_specs=[
                pl.BlockSpec((T, batch_block, 1), lambda b: (0, b, 0)),
                pl.BlockSpec((batch_block, H), lambda b: (b, 0)),
                pl.BlockSpec((batch_block, H), lambda b: (b, 0)),
                pl.BlockSpec((V, 4 * H), lambda b: (0, 0)),   # weights: constant index_map
                pl.BlockSpec((H, 4 * H), lambda b: (0, 0)),
            ],
            out_specs=pl.BlockSpec((batch_block, 2 * H), lambda b: (b, 0)),
        ),
        compiler_params=pltpu.CompilerParams(
            dimension_semantics=("parallel",)),
    )(ids, w_hx, w_cx, prep["g_comb"], prep["whh_t"])

    return hc[:, :H], hc[:, H:]


def word_decoder_forward(summary_words, w_hx, w_cx, prep):
    """Module-faithful forward: ONE LSTMCell step (T == 1 case of the kernel)."""
    ids = summary_words.reshape(1, -1)
    return word_decoder_decode(ids, w_hx, w_cx, prep)


# --------------------------- parameter init ----------------------------------
def init_params(key):
    k = jax.random.split(key, 7)
    embed = jax.random.normal(k[0], (TARGET_SIZE, EMBED_SIZE), jnp.float32) * 0.1
    embed = embed.at[0].set(0.0)  # padding_idx=0
    w_ih = jax.random.normal(k[1], (4 * HIDDEN_SIZE, EMBED_SIZE), jnp.float32) * 0.1
    w_hh = jax.random.normal(k[2], (4 * HIDDEN_SIZE, HIDDEN_SIZE), jnp.float32) * 0.1
    b_ih = jax.random.normal(k[3], (4 * HIDDEN_SIZE,), jnp.float32) * 0.1
    b_hh = jax.random.normal(k[4], (4 * HIDDEN_SIZE,), jnp.float32) * 0.1
    # TODO(synk): nn.Linear(hidden, target) exists in __init__ but is unused in
    # forward(); parameters are created here for fidelity but never lowered.
    lin_w = jax.random.normal(k[5], (TARGET_SIZE, HIDDEN_SIZE), jnp.float32) * 0.1
    lin_b = jax.random.normal(k[6], (TARGET_SIZE,), jnp.float32) * 0.1
    return dict(embed=embed, w_ih=w_ih, w_hh=w_hh, b_ih=b_ih, b_hh=b_hh,
                lin_w=lin_w, lin_b=lin_b)


# --------------------------- pure-JAX reference -------------------------------
def reference_forward(summary_words, w_hx, w_cx, p):
    x = p["embed"][summary_words]                                   # (B, E)
    gates = x @ p["w_ih"].T + p["b_ih"] + w_hx @ p["w_hh"].T + p["b_hh"]
    i, f, g, o = jnp.split(gates, 4, axis=-1)
    c_new = jax.nn.sigmoid(f) * w_cx + jax.nn.sigmoid(i) * jnp.tanh(g)
    h_new = jax.nn.sigmoid(o) * jnp.tanh(c_new)
    return h_new, c_new


def reference_decode(ids_tb, h0, c0, p):
    def step(carry, ids):
        h, c = reference_forward(ids, carry[0], carry[1], p)
        return (h, c), None
    (h, c), _ = lax.scan(step, (h0, c0), ids_tb)
    return h, c


if __name__ == "__main__":
    key = jax.random.PRNGKey(0)
    kp, k1, k2, k3, k4 = jax.random.split(key, 5)
    params = init_params(kp)
    prep = prepare_decoder_params(params)        # hoisted out of the step/decode path

    # ---- single-step (the module's forward) ----
    summary_words = jax.random.randint(k1, (BATCH,), 0, TARGET_SIZE, jnp.int32)
    w_hx = jax.random.normal(k2, (BATCH, HIDDEN_SIZE), jnp.float32)
    w_cx = jax.random.normal(k3, (BATCH, HIDDEN_SIZE), jnp.float32)

    h_new, c_new = word_decoder_forward(summary_words, w_hx, w_cx, prep)
    jax.block_until_ready((h_new, c_new))
    h_ref, c_ref = reference_forward(summary_words, w_hx, w_cx, params)
    assert jnp.allclose(h_new, h_ref, atol=1e-5, rtol=1e-5)
    assert jnp.allclose(c_new, c_ref, atol=1e-5, rtol=1e-5)

    # ---- multi-step: one pallas_call amortized over T tokens ----
    T = 8
    ids_seq = jax.random.randint(k4, (T, BATCH), 0, TARGET_SIZE, jnp.int32)
    h_T, c_T = word_decoder_decode(ids_seq, w_hx, w_cx, prep)
    jax.block_until_ready((h_T, c_T))
    hT_ref, cT_ref = reference_decode(ids_seq, w_hx, w_cx, params)
    assert jnp.allclose(h_T, hT_ref, atol=1e-4, rtol=1e-4)
    assert jnp.allclose(c_T, cT_ref, atol=1e-4, rtol=1e-4)

    print("KERNEL_OK")
</pallas_src>

<mosaic_0001>
module attributes {stable_mosaic.version = 11 : i64} {
  func.func @word_decoder_seq_kernel(%arg0: i32, %arg1: memref<1x8x1xi32, #tpu.memory_space<vmem>>, %arg2: memref<8x32xf32, #tpu.memory_space<vmem>>, %arg3: memref<8x32xf32, #tpu.memory_space<vmem>>, %arg4: memref<64x128xf32, #tpu.memory_space<vmem>>, %arg5: memref<32x128xf32, #tpu.memory_space<vmem>>, %arg6: memref<8x64xf32, #tpu.memory_space<vmem>>) attributes {dimension_semantics = [#tpu.dimension_semantics<parallel>], iteration_bounds = array<i64: 1>, scalar_prefetch = 0 : i64, scratch_operands = 0 : i64, tpu.core_type = #tpu.core_type<tc>, window_params = [{transform_indices = @transform_0, window_bounds = array<i64: 1, 8, 1>}, {transform_indices = @transform_1, window_bounds = array<i64: 8, 32>}, {transform_indices = @transform_2, window_bounds = array<i64: 8, 32>}, {pipeline_mode = #tpu.pipeline_mode<synchronous>, transform_indices = @transform_3, window_bounds = array<i64: 64, 128>}, {pipeline_mode = #tpu.pipeline_mode<synchronous>, transform_indices = @transform_4, window_bounds = array<i64: 32, 128>}, {transform_indices = @transform_5, window_bounds = array<i64: 8, 64>}]} {
    %c0 = arith.constant 0 : index
    %c0_0 = arith.constant 0 : index
    %0 = vector.load %arg4[%c0, %c0_0] : memref<64x128xf32, #tpu.memory_space<vmem>>, vector<64x128xf32>
    %c0_1 = arith.constant 0 : index
    %c0_2 = arith.constant 0 : index
    %1 = vector.load %arg5[%c0_1, %c0_2] : memref<32x128xf32, #tpu.memory_space<vmem>>, vector<32x128xf32>
    %2 = tpu.iota {dimensions = array<i32: 1>} : vector<8x64xi32>
    %c0_3 = arith.constant 0 : index
    %c0_4 = arith.constant 0 : index
    %3 = vector.load %arg2[%c0_3, %c0_4] : memref<8x32xf32, #tpu.memory_space<vmem>>, vector<8x32xf32>
    %c0_5 = arith.constant 0 : index
    %c0_6 = arith.constant 0 : index
    %4 = vector.load %arg3[%c0_5, %c0_6] : memref<8x32xf32, #tpu.memory_space<vmem>>, vector<8x32xf32>
    %c0_i32 = arith.constant 0 : i32
    %5 = arith.index_cast %c0_i32 : i32 to index
    %c0_7 = arith.constant 0 : index
    %c0_8 = arith.constant 0 : index
    %6 = vector.load %arg1[%5, %c0_7, %c0_8] : memref<1x8x1xi32, #tpu.memory_space<vmem>>, vector<1x8x1xi32>
    %7 = vector.shape_cast %6 : vector<1x8x1xi32> to vector<8x1xi32>
    %8 = vector.broadcast %7 : vector<8x1xi32> to vector<8x64xi32>
    %9 = arith.cmpi eq, %2, %8 : vector<8x64xi32>
    %10 = arith.extui %9 : vector<8x64xi1> to vector<8x64xi32>
    %11 = arith.sitofp %10 : vector<8x64xi32> to vector<8x64xf32>
    %cst = arith.constant dense<0.000000e+00> : vector<8x128xf32>
    %12 = tpu.matmul %11, %0, %cst {dimension_numbers = #tpu.dot_dimension_numbers<[1], [0], [0], [1], [0, 0, 1, 1], [], []>} : vector<8x64xf32>, vector<64x128xf32>, vector<8x128xf32> -> vector<8x128xf32>
    %cst_9 = arith.constant dense<0.000000e+00> : vector<8x128xf32>
    %13 = tpu.matmul %3, %1, %cst_9 {dimension_numbers = #tpu.dot_dimension_numbers<[1], [0], [0], [1], [0, 0, 1, 1], [], []>} : vector<8x32xf32>, vector<32x128xf32>, vector<8x128xf32> -> vector<8x128xf32>
    %14 = arith.addf %12, %13 : vector<8x128xf32>
    %15 = arith.negf %14 : vector<8x128xf32>
    %16 = math.exp %15 : vector<8x128xf32>
    %cst_10 = arith.constant 1.000000e+00 : f32
    %17 = vector.broadcast %cst_10 : f32 to vector<8x128xf32>
    %18 = arith.addf %17, %16 : vector<8x128xf32>
    %19 = arith.divf %17, %18 : vector<8x128xf32>
    %20 = math.tanh %14 : vector<8x128xf32>
    %21 = vector.extract_strided_slice %19 {offsets = [0, 0], sizes = [8, 32], strides = [1, 1]} : vector<8x128xf32> to vector<8x32xf32>
    %22 = vector.extract_strided_slice %19 {offsets = [0, 32], sizes = [8, 32], strides = [1, 1]} : vector<8x128xf32> to vector<8x32xf32>
    %23 = vector.extract_strided_slice %20 {offsets = [0, 64], sizes = [8, 32], strides = [1, 1]} : vector<8x128xf32> to vector<8x32xf32>
    %24 = vector.extract_strided_slice %19 {offsets = [0, 96], sizes = [8, 32], strides = [1, 1]} : vector<8x128xf32> to vector<8x32xf32>
    %25 = arith.mulf %22, %4 : vector<8x32xf32>
    %26 = arith.mulf %21, %23 : vector<8x32xf32>
    %27 = arith.addf %25, %26 : vector<8x32xf32>
    %28 = math.tanh %27 : vector<8x32xf32>
    %29 = arith.mulf %24, %28 : vector<8x32xf32>
    %c1_i32 = arith.constant 1 : i32
    %30 = tpu.concatenate %29, %27 in 1 : vector<8x32xf32>, vector<8x32xf32> -> vector<8x64xf32>
    %c0_11 = arith.constant 0 : index
    %c0_12 = arith.constant 0 : index
    %31 = vector.load %arg6[%c0_11, %c0_12] : memref<8x64xf32, #tpu.memory_space<vmem>>, vector<8x64xf32>
    tpu.vector_store %arg6[%c0_11, %c0_12], %30 {strides = array<i32>} : memref<8x64xf32, #tpu.memory_space<vmem>>, vector<8x64xf32>,
    return
  }
  func.func @transform_0(%arg0: i32) -> (i32, i32, i32) {
    %c0_i32 = arith.constant 0 : i32
    %c0_i32_0 = arith.constant 0 : i32
    %c0_i32_1 = arith.constant 0 : i32
    return %c0_i32, %arg0, %c0_i32_0 : i32, i32, i32
  }
  func.func @transform_1(%arg0: i32) -> (i32, i32) {
    %c0_i32 = arith.constant 0 : i32
    %c0_i32_0 = arith.constant 0 : i32
    return %arg0, %c0_i32 : i32, i32
  }
  func.func @transform_2(%arg0: i32) -> (i32, i32) {
    %c0_i32 = arith.constant 0 : i32
    %c0_i32_0 = arith.constant 0 : i32
    return %arg0, %c0_i32 : i32, i32
  }
  func.func @transform_3(%arg0: i32) -> (i32, i32) {
    %c0_i32 = arith.constant 0 : i32
    %c0_i32_0 = arith.constant 0 : i32
    %c0_i32_1 = arith.constant 0 : i32
    return %c0_i32, %c0_i32_0 : i32, i32
  }
  func.func @transform_4(%arg0: i32) -> (i32, i32) {
    %c0_i32 = arith.constant 0 : i32
    %c0_i32_0 = arith.constant 0 : i32
    %c0_i32_1 = arith.constant 0 : i32
    return %c0_i32, %c0_i32_0 : i32, i32
  }
  func.func @transform_5(%arg0: i32) -> (i32, i32) {
    %c0_i32 = arith.constant 0 : i32
    %c0_i32_0 = arith.constant 0 : i32
    return %arg0, %c0_i32 : i32, i32
  }
}

</mosaic_0001>

<bundles_post_ra>
// kernel: tpu_custom_call.1
= control target key start
LH: loop header
LB: loop body
LE: loop exit
PB: predicated region body
PF: predicated region fallthrough
CT: control target
= control target key end

     0   :  { %10 = vsyncpa [#allocation3], 0  ;;  %s522_s0 = inlined_call_operand.vmem [shape: s32[1,8,1], index: 0, kind: input, shape index: {}]   ;;  %s523_s1 = inlined_call_operand.vmem [shape: f32[8,32], index: 1, kind: input, shape index: {}]   ;;  %s524_s2 = inlined_call_operand.vmem [shape: f32[8,32], index: 2, kind: input, shape index: {}]   ;;  %s525_s3 = inlined_call_operand.hbm [shape: f32[64,128], index: 3, kind: input, shape index: {}]   ;;  %s526_s4 = inlined_call_operand.hbm [shape: f32[32,128], index: 4, kind: input, shape index: {}]   ;;  %s527_s5 = inlined_call_operand.hbm [shape: f32[8,64], index: 5, kind: output, shape index: {}]  }
   0x1   :  { %11 = vsyncpa [#allocation6], 0 }
   0x2   :  { %12 = vsyncpa [#allocation4], 0  ;;  %s429_s18 = smov [#allocation2]   ;;  %s357_s22 = scalar_lea.hbm %s525_s3, 1024 }
   0x3   :  { %s24_s19 = sshll.u32 %s429_s18, 4  ;;  %p358_p0 = scmp.ne.s32.totalorder %s525_s3, %s357_s22  ;;  %s25_s19 = int_to_ptr.vmem [resolvable:$true] %s24_s19 }
   0x4   :  { %p361_p1 = scmp.lt.u32.totalorder %s357_s22, %s525_s3 }
   0x6   :  { %p363_p2 = pnand %p361_p1, %p358_p0 }
   0x8   :  { %366 = shalt.err (!%p363_p2)
}
   0x9   :  { %s367_s27 = scalar_lea.vmem %s25_s19, 1024  ;;  %p372_p4 = scmp.lt.s32.totalorder %s25_s19, %s25_s19 }
   0xa   :  { %p368_p3 = scmp.ne.s32.totalorder %s25_s19, %s367_s27  ;;  %p373_p5 = scmp.lt.s32.totalorder %s367_s27, %s367_s27 }
   0xc   :  { %p374_p6 = por %p373_p5, %p372_p4 }
   0xe   :  { %p375_p7 = pnand %p374_p6, %p368_p3 }
  0x10   :  { %378 = shalt.err (!%p375_p7)
}
  0x11   :  { %s430_s28 = smov 128   ;;  %s431_s29 = smov 8  }
  0x12   :  { %30 = dma.hbm_to_vmem [thread:$0]  %s525_s3, 1024, %s25_s19, [#allocation3], %s430_s28, %s430_s28, %s431_s29  }
  0x13   :  { %s432_s7 = smov [#allocation5]   ;;  %s379_s11 = scalar_lea.hbm %s526_s4, 512 }
  0x14   :  { %s36_s8 = sshll.u32 %s432_s7, 4  ;;  %p380_p8 = scmp.ne.s32.totalorder %s526_s4, %s379_s11  ;;  %s37_s8 = int_to_ptr.vmem [resolvable:$true] %s36_s8 }
  0x15   :  { %p383_p9 = scmp.lt.u32.totalorder %s379_s11, %s526_s4 }
  0x17   :  { %p385_p10 = pnand %p383_p9, %p380_p8 }
  0x19   :  { %388 = shalt.err (!%p385_p10)
}
  0x1a   :  { %s389_s16 = scalar_lea.vmem %s37_s8, 512  ;;  %p394_p12 = scmp.lt.s32.totalorder %s37_s8, %s37_s8 }
  0x1b   :  { %p390_p11 = scmp.ne.s32.totalorder %s37_s8, %s389_s16  ;;  %p395_p13 = scmp.lt.s32.totalorder %s389_s16, %s389_s16 }
  0x1d   :  { %p396_p0 = por %p395_p13, %p394_p12 }
  0x1f   :  { %p397_p1 = pnand %p396_p0, %p390_p11 }
  0x21   :  { %400 = shalt.err (!%p397_p1)
}
  0x22   :  { %42 = dma.hbm_to_vmem [thread:$0]  %s526_s4, 512, %s37_s8, [#allocation6], %s430_s28, %s430_s28, %s431_s29  }
  0x23   :  { %423 = dma.done.wait [#allocation3], 1024  }
  0x24   :  { %424 = vsyncadd [#allocation3], 4294966272 }
  0x25   :  { %425 = dma.done.wait [#allocation6], 512  }
  0x26   :  { %426 = vsyncadd [#allocation6], 4294966784  ;;  %v433_v0 = vmov 0   ;;  %v434_v1 = vmov 0.0|0.0   ;;  %v65_v2 = vld [vmem:[%s522_s0] sm:$0xff]  ;;  %v49_v3 = vld [vmem:[#allocation2] sm:$0xff]  ;;  %v61_v24 = vlaneseq }
  0x27   :  { %348 = vset.pattern.permute.xlu0 %v433_v0  ;;  %324 = vmatprep.subr.bf16.mxu0 %v434_v1  ;;  %v50_v4 = vld [vmem:[#allocation2 + $0x8] sm:$0xff]  ;;  %v51_v6 = vld [vmem:[#allocation2 + $0x10] sm:$0xff]  ;;  %v52_v7 = vld [vmem:[#allocation2 + $0x18] sm:$0xff]  ;;  %vm435_vm0 = vmmov 0   ;;  %v436_v9 = vmov 0.0   ;;  %s437_s20 = smov 32  }
  0x28   :  { %318 = vmatprep.subr.bf16.mxu1 %v434_v1  ;;  %67 = vperm.xlu0 %348, %v65_v2   ;;  %v325_v5 = vpack.c.bf16 %v50_v4, %v49_v3  ;;  %v57_v8 = vld [vmem:[#allocation5] sm:$0xff]  ;;  %v58_v10 = vld [vmem:[#allocation5 + $0x8] sm:$0xff]  ;;  %v328_v11 = vpack.c.bf16 %v52_v7, %v51_v6  ;;  %v59_v13 = vld [vmem:[#allocation5 + $0x10] sm:$0xff]  ;;  %vm72_vm1 = vcmask 261120   ;;  %v62_v25 = vand.u32 127, %v61_v24 }
  0x29   :  { %296 = vmatprep.mubr.msk.f32.mxu1 %vm435_vm0, %v436_v9  ;;  %315 = vmatprep.mubr.msk.f32.mxu0 %vm435_vm0, %v436_v9  ;;  %v319_v12 = vpack.c.bf16 %v58_v10, %v57_v8  ;;  %v60_v14 = vld [vmem:[#allocation5 + $0x18] sm:$0xff]  ;;  %v53_v15 = vld [vmem:[#allocation2 + $0x20] sm:$0xff]  ;;  %v54_v16 = vld [vmem:[#allocation2 + $0x28] sm:$0xff]  ;;  %vm146_vm2 = vcmask 523264  }
  0x2a   :  { %326 = vmatpush3.bf16.msra.mxu0 %v325_v5  ;;  %v64_v17 = vld [vmem:[%s524_s2] sm:$0xff]  ;;  %v322_v18 = vpack.c.bf16 %v60_v14, %v59_v13  ;;  %v331_v19 = vpack.c.bf16 %v54_v16, %v53_v15  ;;  %v56_v21 = vld [vmem:[#allocation2 + $0x38] sm:$0xff]  ;;  %s439_s2 = smov [#allocation7]  }
  0x2b   :  { %327 = vmatprep.subr.bf16.mxu0 %v434_v1  ;;  %320 = vmatpush3.bf16.msra.mxu1 %v319_v12  ;;  %v55_v20 = vld [vmem:[#allocation2 + $0x30] sm:$0xff]  ;;  %s260_s23 = sshll.u32 %s439_s2, 4  ;;  %s261_s23 = int_to_ptr.vmem [resolvable:$true] %s260_s23 }
  0x2c   :  { %228 = vrot.lane.b32.xlu1 %v64_v17, %s437_s20  ;;  %321 = vmatprep.subr.bf16.mxu1 %v434_v1  ;;  %v63_v22 = vld [vmem:[%s523_s1] sm:$0xff]  ;;  %v334_v23 = vpack.c.bf16 %v56_v21, %v55_v20  ;;  %s438_s1 = smov 64   ;;  %s401_s24 = scalar_lea.vmem %s261_s23, 128 }
  0x2d   :  { %p402_p2 = scmp.ne.s32.totalorder %s261_s23, %s401_s24  ;;  %p406_p3 = scmp.lt.s32.totalorder %s261_s23, %s261_s23 }
  0x2e   :  { %329 = vmatpush3.bf16.msra.mxu0 %v328_v11  ;;  %p407_p4 = scmp.lt.s32.totalorder %s401_s24, %s401_s24 }
  0x2f   :  { %330 = vmatprep.subr.bf16.mxu0 %v434_v1  ;;  %323 = vmatpush3.bf16.msra.mxu1 %v322_v18 }
  0x30   :  { %p408_p5 = por %p407_p4, %p406_p3 }
  0x32   :  { %332 = vmatpush3.bf16.msra.mxu0 %v331_v19  ;;  %297 = vmatmul.mubr.msk.f32.vlgmr.msra.gmra.mrb[0].mxu1 %vm72_vm1, %v63_v22  ;;  %p409_p6 = pnand %p408_p5, %p402_p2 }
  0x33   :  { %333 = vmatprep.subr.bf16.mxu0 %v434_v1 }
  0x36   :  { %335 = vmatpush3.bf16.msra.mxu0 %v334_v23 }
  0x9e   :  { %v229_v40 = vpop.permute.xlu1 %228 }
  0xa7   :  { %v68_v26 = vpop.permute.xlu0 %67 }
  0xa8   :  { %vm69_vm3 = vcmp.eq.s32.totalorder %v62_v25, %v68_v26 }
  0xa9   :  { %v270_v27 = vsel %vm69_vm3, 1.0, %v436_v9 }
  0xaa   :  { %316 = vmatmul.mubr.msk.f32.vlgmr.msra.gmra.mrb[0].mxu0 %vm146_vm2, %v270_v27 }
 0x105   :  { %v142_v28 = vpop.f32.mrb[0].mxu1 }
 0x106   :  { %v298_v29 = vpop.f32.mrb[1].mxu1 }
 0x17d   :  { %v216_v30 = vpop.f32.mrb[0].mxu0 }
 0x17e   :  { %v217_v31 = vadd.f32 %v216_v30, %v142_v28  ;;  %v317_v32 = vpop.f32.mrb[1].mxu0 }
 0x180   :  { %349 = vtanh.f32 %v217_v31  ;;  %v273_v34 = vmul.f32 -1.442695, %v217_v31 }
 0x182   :  { %351 = vpow2.f32 %v273_v34 }
 0x18a   :  { %v350_v33 = vpop.eup %349 }
 0x18b   :  { %233 = vrot.lane.b32.xlu0 %v350_v33, %s438_s1 }
 0x18c   :  { %v352_v35 = vpop.eup %351 }
 0x18d   :  { %v223_v36 = vadd.f32 1.0, %v352_v35 }
 0x18f   :  { %353 = vrcp.f32 %v223_v36 }
 0x199   :  { %v354_v37 = vpop.eup %353 }
 0x19a   :  { %v231_v41 = vmul.f32 %v354_v37, %v229_v40 }
 0x1fd   :  { %v234_v38 = vpop.permute.xlu0 %233 }
 0x1fe   :  { %v236_v39 = vmul.f32 %v354_v37, %v234_v38 }
 0x200   :  { %238 = vrot.lane.b32.xlu1 %v236_v39, %s437_s20 }
 0x272   :  { %v239_v42 = vpop.permute.xlu1 %238 }
 0x273   :  { %v241_v43 = vadd.f32 %v239_v42, %v231_v41 }
 0x275   :  { %355 = vtanh.f32 %v241_v43 }
 0x27f   :  { %v356_v44 = vpop.eup %355 }
 0x280   :  { %244 = vrot.lane.b32.xlu0 %v356_v44, %s438_s1 }
 0x2f2   :  { %v245_v45 = vpop.permute.xlu0 %244 }
 0x2f3   :  { %v247_v46 = vmul.f32 %v354_v37, %v245_v45 }
 0x2f5   :  { %249 = vrot.lane.b32.xlu1 %v247_v46, %s437_s20 }
 0x367   :  { %v250_v47 = vpop.permute.xlu1 %249 }
 0x368   :  { %v252_v48 = vsel %vm72_vm1, %v250_v47, %v241_v43 }
 0x369   :  { %253 = vst.msk [vmem:[#allocation7] sm:$0xff] %vm146_vm2, %v252_v48 }
 0x36a   :  { %412 = shalt.err (!%p409_p6)
}
 0x36b   :  { %s413_s27 = scalar_lea.hbm %s527_s5, 128 }
 0x36c   :  { %p414_p7 = scmp.ne.s32.totalorder %s527_s5, %s413_s27  ;;  %p417_p8 = scmp.lt.u32.totalorder %s413_s27, %s527_s5 }
 0x36e   :  { %p419_p9 = pnand %p417_p8, %p414_p7 }
 0x370   :  { %422 = shalt.err (!%p419_p9)
}
 0x371   :  { %263 = dma.vmem_to_hbm [thread:$0]  %s261_s23, 128, %s527_s5, [#allocation4]  }
 0x372   :  { %427 = dma.done.wait [#allocation4], 128  }
 0x373   :  { %428 = vsyncadd [#allocation4], 4294967168 }
 0x374   :  { %267 = vsyncpa [#allocation3], 1 }
 0x375   :  { %268 = vsyncpa [#allocation6], 1 }
 0x376   :  { %269 = vsyncpa [#allocation4], 1 }

</bundles_post_ra>
